<compile_context>
chip_gen: v5e
topology: v5e:2x2
jax: 0.10.0
libtpu: 0.0.40
codegen_flags: <defaults>
</compile_context>

<pallas_src>
import functools
import math

import jax
import jax.numpy as jnp
from jax import lax
from jax.experimental import pallas as pl
from jax.experimental.pallas import tpu as pltpu


def _round_up(x, m):
    return (x + m - 1) // m * m


def _pick_tile(padded, candidates):
    for c in candidates:
        if padded % c == 0:
            return c
    return candidates[-1]


def _vmem_limit(per_step_bytes):
    # double-buffered tiles + headroom for Mosaic-internal scratch;
    # clamp to 48 MiB (below every generation's physical VMEM, incl. v7x).
    return int(min(max(per_step_bytes * 2 + (4 << 20), 16 << 20), 48 << 20))


# ----------------------------------------------------------------------------
# Kernel 1: BertPredictionHeadTransform (fused dense + bias-gelu + LayerNorm)
#   y   = x @ W1            (W1 stored (hidden_in, hidden_out), bf16)
#   z   = bias_gelu(b1, y)  (tanh-approx GeLU, as in the fused GeLUFunction)
#   out = LayerNorm(z) * gamma + beta    (eps = 1e-5, f32 math)
# ----------------------------------------------------------------------------
def _transform_kernel(x_ref, w_ref, b_ref, gamma_ref, beta_ref, o_ref):
    # bf16 x bf16 MXU matmul, f32 accumulation.
    y = jnp.dot(x_ref[...], w_ref[...], preferred_element_type=jnp.float32)
    z = y + b_ref[...]                                        # (tm, H) + (1, H), f32
    # bias_gelu (tanh approximation used by the fused CUDA path)
    h = z * 0.5 * (1.0 + jnp.tanh(0.79788456 * z * (1.0 + 0.044715 * z * z)))
    # LayerNorm over the hidden axis, eps=1e-5, f32 math
    u = jnp.mean(h, axis=-1, keepdims=True)
    d = h - u
    s = jnp.mean(d * d, axis=-1, keepdims=True)
    nrm = d * lax.rsqrt(s + 1e-5)
    o_ref[...] = (gamma_ref[...] * nrm + beta_ref[...]).astype(o_ref.dtype)


def transform_pallas(x, w1, b1, gamma, beta, *, tm, out_dtype):
    T, H = x.shape
    assert T % tm == 0, (T, tm)
    per_step = (tm * H * x.dtype.itemsize            # x tile
                + H * H * w1.dtype.itemsize          # resident W1
                + tm * H * jnp.dtype(out_dtype).itemsize  # out tile
                + 3 * H * 4)                         # b1 / gamma / beta
    return pl.pallas_call(
        _transform_kernel,
        out_shape=jax.ShapeDtypeStruct((T, H), out_dtype),
        grid_spec=pltpu.PrefetchScalarGridSpec(
            num_scalar_prefetch=0,
            grid=(T // tm,),
            in_specs=[
                pl.BlockSpec((tm, H), lambda i: (i, 0)),
                pl.BlockSpec((H, H), lambda i: (0, 0)),     # W1 resident
                pl.BlockSpec((1, H), lambda i: (0, 0)),
                pl.BlockSpec((1, H), lambda i: (0, 0)),
                pl.BlockSpec((1, H), lambda i: (0, 0)),
            ],
            out_specs=pl.BlockSpec((tm, H), lambda i: (i, 0)),
        ),
        compiler_params=pltpu.CompilerParams(
            dimension_semantics=("parallel",),
            vmem_limit_bytes=_vmem_limit(per_step)),
    )(x, w1, b1, gamma, beta)


# ----------------------------------------------------------------------------
# Kernel 2: BertLMPredictionHead decoder
#   logits = h @ E_T + dec_bias      (E_T: (hidden, vocab_pad), bf16, tied)
# ----------------------------------------------------------------------------
def _decoder_kernel(h_ref, et_ref, bias_ref, o_ref):
    logits = jnp.dot(h_ref[...], et_ref[...],
                     preferred_element_type=jnp.float32)
    o_ref[...] = (logits + bias_ref[...]).astype(o_ref.dtype)


def decoder_pallas(h, emb_t, dec_bias, *, tm, tn):
    Tm, H = h.shape
    _, V_pad = emb_t.shape
    assert Tm % tm == 0 and V_pad % tn == 0, (Tm, tm, V_pad, tn)
    per_step = (tm * H * h.dtype.itemsize            # h tile
                + H * tn * emb_t.dtype.itemsize      # E tile
                + tm * tn * 4                        # f32 logits tile
                + tn * 4)                            # bias tile
    return pl.pallas_call(
        _decoder_kernel,
        out_shape=jax.ShapeDtypeStruct((Tm, V_pad), jnp.float32),
        grid_spec=pltpu.PrefetchScalarGridSpec(
            num_scalar_prefetch=0,
            # vocab OUTER (TC-sharded parallel axis on v7x), rows INNER:
            # E's block index depends only on the outer axis, so the tied
            # embedding matrix streams from HBM exactly once; the (small)
            # h tile is re-fetched per vocab tile instead.
            grid=(V_pad // tn, Tm // tm),
            in_specs=[
                pl.BlockSpec((tm, H), lambda i, j: (j, 0)),
                pl.BlockSpec((H, tn), lambda i, j: (0, i)),   # resident across inner axis
                pl.BlockSpec((1, tn), lambda i, j: (0, i)),
            ],
            out_specs=pl.BlockSpec((tm, tn), lambda i, j: (j, i)),
        ),
        compiler_params=pltpu.CompilerParams(
            dimension_semantics=("parallel", "parallel"),
            vmem_limit_bytes=_vmem_limit(per_step)),
    )(h, emb_t, dec_bias)


# ----------------------------------------------------------------------------
# One-time parameter preparation (OUTSIDE jit): bf16 casts, pre-transpose and
# pre-pad the tied embedding so no per-call pad / cast touches the ~94 MB E.
# ----------------------------------------------------------------------------
def prepare_params(params, *, max_vocab_tile=2048, compute_dtype=jnp.bfloat16):
    V, H = params["emb"].shape
    vocab_pad_unit = min(max_vocab_tile, _round_up(V, 128))
    V_pad = _round_up(V, vocab_pad_unit)
    emb_t = params["emb"].T                                   # (H, V)
    dec_bias = params["dec_bias"]                             # (1, V)
    if V_pad != V:
        emb_t = jnp.pad(emb_t, ((0, 0), (0, V_pad - V)))
        dec_bias = jnp.pad(dec_bias, ((0, 0), (0, V_pad - V)))
    return dict(
        w1=params["w1"].astype(compute_dtype),                # (H, H) bf16
        b1=params["b1"].astype(jnp.float32),                  # (1, H)
        ln_gamma=params["ln_gamma"].astype(jnp.float32),      # (1, H)
        ln_beta=params["ln_beta"].astype(jnp.float32),        # (1, H)
        emb_t=emb_t.astype(compute_dtype),                    # (H, V_pad) bf16
        dec_bias=dec_bias.astype(jnp.float32),                # (1, V_pad)
    )


# ----------------------------------------------------------------------------
# Module wrapper: BertPreTrainingHeads.forward
# ----------------------------------------------------------------------------
def bert_pretraining_heads_forward(prepared, sequence_output, pooled_output,
                                   masked_token_indexes=None, *,
                                   vocab_size,
                                   max_row_tile=512, max_vocab_tile=2048,
                                   compute_dtype=jnp.bfloat16):
    # pooled_output is unused by the PyTorch forward (only prediction_scores
    # are returned by this module variant).
    del pooled_output
    B, S, H = sequence_output.shape
    x = sequence_output.reshape(B * S, H)                     # glue reshape

    # Gather masked tokens BEFORE the transform: the transform is per-row so
    # this is numerically identical to the PyTorch order and skips the work
    # on un-masked tokens.
    if masked_token_indexes is not None:
        x = jnp.take(x, masked_token_indexes, axis=0)         # glue gather
    n_rows = x.shape[0]
    if n_rows == 0:
        return jnp.zeros((0, vocab_size), jnp.float32)

    # Pad rows to a multiple of 128 (<=127 wasted rows), pick a row tile that
    # divides the padded count.
    rows_pad = _round_up(n_rows, 128)
    row_tile = _pick_tile(
        rows_pad, tuple(c for c in (512, 256, 128) if c <= max_row_tile) or (128,))
    if rows_pad != n_rows:
        x = jnp.pad(x, ((0, rows_pad - n_rows), (0, 0)))
    x = x.astype(compute_dtype)                               # bf16 MXU operand

    h = transform_pallas(x, prepared["w1"], prepared["b1"],
                         prepared["ln_gamma"], prepared["ln_beta"],
                         tm=row_tile, out_dtype=compute_dtype)

    emb_t = prepared["emb_t"]
    dec_bias = prepared["dec_bias"]
    V_pad = emb_t.shape[1]
    vocab_tile = _pick_tile(
        V_pad, tuple(c for c in (2048, 1024, 512, 256, 128) if c <= max_vocab_tile))

    scores = decoder_pallas(h, emb_t, dec_bias, tm=row_tile, tn=vocab_tile)
    return scores[:n_rows, :vocab_size]


# ----------------------------------------------------------------------------
# Pure-JAX f32 reference (PyTorch order: transform, then gather, then decode)
# ----------------------------------------------------------------------------
def reference_forward(params, sequence_output, masked_token_indexes):
    B, S, H = sequence_output.shape
    x = sequence_output.reshape(B * S, H).astype(jnp.float32)
    y = x @ params["w1"] + params["b1"]
    z = y * 0.5 * (1.0 + jnp.tanh(0.79788456 * y * (1.0 + 0.044715 * y * y)))
    u = z.mean(-1, keepdims=True)
    s = ((z - u) ** 2).mean(-1, keepdims=True)
    h = params["ln_gamma"] * ((z - u) / jnp.sqrt(s + 1e-5)) + params["ln_beta"]
    if masked_token_indexes is not None:
        h = jnp.take(h, masked_token_indexes, axis=0)
    return h @ params["emb"].T + params["dec_bias"]


# ----------------------------------------------------------------------------
# Deterministic parameter init (mimics shapes from __init__; synthetic values)
# ----------------------------------------------------------------------------
def init_params(key, hidden, vocab):
    k1, k2, k3 = jax.random.split(key, 3)
    bound_w = 1.0 / math.sqrt(hidden)
    # dense weight stored as (in, out) so the kernel does x @ W1 directly
    w1 = jax.random.uniform(k1, (hidden, hidden), jnp.float32, -bound_w, bound_w)
    b1 = jax.random.uniform(k2, (1, hidden), jnp.float32, -bound_w, bound_w)
    ln_gamma = jnp.ones((1, hidden), jnp.float32)
    ln_beta = jnp.zeros((1, hidden), jnp.float32)
    # tied embedding weights: (vocab, hidden)
    emb = 0.02 * jax.random.normal(k3, (vocab, hidden), jnp.float32)
    dec_bias = jnp.zeros((1, vocab), jnp.float32)
    return dict(w1=w1, b1=b1, ln_gamma=ln_gamma, ln_beta=ln_beta,
                emb=emb, dec_bias=dec_bias)


if __name__ == "__main__":
    # Small shapes; V=300 deliberately non-multiple of 128 to exercise the
    # pre-padded vocab path + final slice.
    B, S, H, V = 2, 8, 128, 300
    key = jax.random.PRNGKey(0)
    kp, kx, kpool = jax.random.split(key, 3)

    params = init_params(kp, H, V)
    prepared = prepare_params(params)                         # once, outside jit
    sequence_output = jax.random.normal(kx, (B, S, H), jnp.float32)
    pooled_output = jax.random.normal(kpool, (B, H), jnp.float32)
    # 8 masked token positions into the flattened (B*S) token axis
    masked_token_indexes = jnp.array([0, 2, 3, 5, 7, 9, 12, 15], jnp.int32)

    fwd = jax.jit(functools.partial(bert_pretraining_heads_forward,
                                    vocab_size=V))

    # Masked path
    scores = fwd(prepared, sequence_output, pooled_output, masked_token_indexes)
    jax.block_until_ready(scores)
    assert scores.shape == (masked_token_indexes.shape[0], V)
    assert bool(jnp.all(jnp.isfinite(scores)))
    ref = reference_forward(params, sequence_output, masked_token_indexes)
    # bf16 x / W1 / h / tied-E on the MXU vs f32 reference -> loose tolerance.
    assert bool(jnp.allclose(scores, ref, atol=5e-2, rtol=5e-2)), \
        float(jnp.max(jnp.abs(scores - ref)))

    # Unmasked path (masked_token_indexes=None): all B*S rows
    scores_all = fwd(prepared, sequence_output, pooled_output, None)
    jax.block_until_ready(scores_all)
    assert scores_all.shape == (B * S, V)
    ref_all = reference_forward(params, sequence_output, None)
    assert bool(jnp.allclose(scores_all, ref_all, atol=5e-2, rtol=5e-2)), \
        float(jnp.max(jnp.abs(scores_all - ref_all)))

    print("KERNEL_OK")
</pallas_src>

<mosaic_0001>
module attributes {stable_mosaic.version = 11 : i64} {
  func.func @_decoder_kernel(%arg0: i32, %arg1: i32, %arg2: memref<128x128xbf16, #tpu.memory_space<vmem>>, %arg3: memref<128x128xbf16, #tpu.memory_space<vmem>>, %arg4: memref<1x128xf32, #tpu.memory_space<vmem>>, %arg5: memref<128x128xf32, #tpu.memory_space<vmem>>) attributes {dimension_semantics = [#tpu.dimension_semantics<parallel>, #tpu.dimension_semantics<parallel>], iteration_bounds = array<i64: 3, 1>, scalar_prefetch = 0 : i64, scratch_operands = 0 : i64, tpu.core_type = #tpu.core_type<tc>, window_params = [{transform_indices = @transform_0, window_bounds = array<i64: 128, 128>}, {transform_indices = @transform_1, window_bounds = array<i64: 128, 128>}, {transform_indices = @transform_2, window_bounds = array<i64: 1, 128>}, {transform_indices = @transform_3, window_bounds = array<i64: 128, 128>}]} {
    %c0 = arith.constant 0 : index
    %c0_0 = arith.constant 0 : index
    %0 = vector.load %arg2[%c0, %c0_0] : memref<128x128xbf16, #tpu.memory_space<vmem>>, vector<128x128xbf16>
    %c0_1 = arith.constant 0 : index
    %c0_2 = arith.constant 0 : index
    %1 = vector.load %arg3[%c0_1, %c0_2] : memref<128x128xbf16, #tpu.memory_space<vmem>>, vector<128x128xbf16>
    %cst = arith.constant dense<0.000000e+00> : vector<128x128xf32>
    %2 = tpu.matmul %0, %1, %cst {dimension_numbers = #tpu.dot_dimension_numbers<[1], [0], [0], [1], [0, 0, 1, 1], [], []>} : vector<128x128xbf16>, vector<128x128xbf16>, vector<128x128xf32> -> vector<128x128xf32>
    %c0_3 = arith.constant 0 : index
    %c0_4 = arith.constant 0 : index
    %3 = vector.load %arg4[%c0_3, %c0_4] : memref<1x128xf32, #tpu.memory_space<vmem>>, vector<1x128xf32>
    %4 = vector.broadcast %3 : vector<1x128xf32> to vector<128x128xf32>
    %5 = arith.addf %2, %4 : vector<128x128xf32>
    %c0_5 = arith.constant 0 : index
    %c0_6 = arith.constant 0 : index
    %6 = vector.load %arg5[%c0_5, %c0_6] : memref<128x128xf32, #tpu.memory_space<vmem>>, vector<128x128xf32>
    tpu.vector_store %arg5[%c0_5, %c0_6], %5 {strides = array<i32>} : memref<128x128xf32, #tpu.memory_space<vmem>>, vector<128x128xf32>,
    return
  }
  func.func @transform_0(%arg0: i32, %arg1: i32) -> (i32, i32) {
    %c0_i32 = arith.constant 0 : i32
    %c0_i32_0 = arith.constant 0 : i32
    return %arg1, %c0_i32 : i32, i32
  }
  func.func @transform_1(%arg0: i32, %arg1: i32) -> (i32, i32) {
    %c0_i32 = arith.constant 0 : i32
    %c0_i32_0 = arith.constant 0 : i32
    return %c0_i32, %arg0 : i32, i32
  }
  func.func @transform_2(%arg0: i32, %arg1: i32) -> (i32, i32) {
    %c0_i32 = arith.constant 0 : i32
    %c0_i32_0 = arith.constant 0 : i32
    return %c0_i32, %arg0 : i32, i32
  }
  func.func @transform_3(%arg0: i32, %arg1: i32) -> (i32, i32) {
    %c0_i32 = arith.constant 0 : i32
    return %arg1, %arg0 : i32, i32
  }
}

module attributes {stable_mosaic.version = 11 : i64} {
  func.func @_transform_kernel(%arg0: i32, %arg1: memref<128x128xbf16, #tpu.memory_space<vmem>>, %arg2: memref<128x128xbf16, #tpu.memory_space<vmem>>, %arg3: memref<1x128xf32, #tpu.memory_space<vmem>>, %arg4: memref<1x128xf32, #tpu.memory_space<vmem>>, %arg5: memref<1x128xf32, #tpu.memory_space<vmem>>, %arg6: memref<128x128xbf16, #tpu.memory_space<vmem>>) attributes {dimension_semantics = [#tpu.dimension_semantics<parallel>], iteration_bounds = array<i64: 1>, scalar_prefetch = 0 : i64, scratch_operands = 0 : i64, tpu.core_type = #tpu.core_type<tc>, window_params = [{transform_indices = @transform_0, window_bounds = array<i64: 128, 128>}, {pipeline_mode = #tpu.pipeline_mode<synchronous>, transform_indices = @transform_1, window_bounds = array<i64: 128, 128>}, {pipeline_mode = #tpu.pipeline_mode<synchronous>, transform_indices = @transform_2, window_bounds = array<i64: 1, 128>}, {pipeline_mode = #tpu.pipeline_mode<synchronous>, transform_indices = @transform_3, window_bounds = array<i64: 1, 128>}, {pipeline_mode = #tpu.pipeline_mode<synchronous>, transform_indices = @transform_4, window_bounds = array<i64: 1, 128>}, {transform_indices = @transform_5, window_bounds = array<i64: 128, 128>}]} {
    %c0 = arith.constant 0 : index
    %c0_0 = arith.constant 0 : index
    %0 = vector.load %arg1[%c0, %c0_0] : memref<128x128xbf16, #tpu.memory_space<vmem>>, vector<128x128xbf16>
    %c0_1 = arith.constant 0 : index
    %c0_2 = arith.constant 0 : index
    %1 = vector.load %arg2[%c0_1, %c0_2] : memref<128x128xbf16, #tpu.memory_space<vmem>>, vector<128x128xbf16>
    %cst = arith.constant dense<0.000000e+00> : vector<128x128xf32>
    %2 = tpu.matmul %0, %1, %cst {dimension_numbers = #tpu.dot_dimension_numbers<[1], [0], [0], [1], [0, 0, 1, 1], [], []>} : vector<128x128xbf16>, vector<128x128xbf16>, vector<128x128xf32> -> vector<128x128xf32>
    %c0_3 = arith.constant 0 : index
    %c0_4 = arith.constant 0 : index
    %3 = vector.load %arg3[%c0_3, %c0_4] : memref<1x128xf32, #tpu.memory_space<vmem>>, vector<1x128xf32>
    %4 = vector.broadcast %3 : vector<1x128xf32> to vector<128x128xf32>
    %5 = arith.addf %2, %4 : vector<128x128xf32>
    %cst_5 = arith.constant 5.000000e-01 : f32
    %6 = vector.broadcast %cst_5 : f32 to vector<128x128xf32>
    %7 = arith.mulf %5, %6 : vector<128x128xf32>
    %cst_6 = arith.constant 0.797884583 : f32
    %8 = vector.broadcast %cst_6 : f32 to vector<128x128xf32>
    %9 = arith.mulf %8, %5 : vector<128x128xf32>
    %cst_7 = arith.constant 4.471500e-02 : f32
    %10 = vector.broadcast %cst_7 : f32 to vector<128x128xf32>
    %11 = arith.mulf %10, %5 : vector<128x128xf32>
    %12 = arith.mulf %11, %5 : vector<128x128xf32>
    %cst_8 = arith.constant 1.000000e+00 : f32
    %13 = vector.broadcast %cst_8 : f32 to vector<128x128xf32>
    %14 = arith.addf %13, %12 : vector<128x128xf32>
    %15 = arith.mulf %9, %14 : vector<128x128xf32>
    %16 = math.tanh %15 : vector<128x128xf32>
    %cst_9 = arith.constant 1.000000e+00 : f32
    %17 = vector.broadcast %cst_9 : f32 to vector<128x128xf32>
    %18 = arith.addf %17, %16 : vector<128x128xf32>
    %19 = arith.mulf %7, %18 : vector<128x128xf32>
    %cst_10 = arith.constant dense<0.000000e+00> : vector<128xf32>
    %20 = vector.multi_reduction <add>, %19, %cst_10 [1] : vector<128x128xf32> to vector<128xf32>
    %21 = vector.shape_cast %20 : vector<128xf32> to vector<128x1xf32>
    %cst_11 = arith.constant 1.280000e+02 : f32
    %22 = vector.broadcast %cst_11 : f32 to vector<128x1xf32>
    %23 = arith.divf %21, %22 : vector<128x1xf32>
    %24 = vector.broadcast %23 : vector<128x1xf32> to vector<128x128xf32>
    %25 = arith.subf %19, %24 : vector<128x128xf32>
    %26 = arith.mulf %25, %25 : vector<128x128xf32>
    %cst_12 = arith.constant dense<0.000000e+00> : vector<128xf32>
    %27 = vector.multi_reduction <add>, %26, %cst_12 [1] : vector<128x128xf32> to vector<128xf32>
    %28 = vector.shape_cast %27 : vector<128xf32> to vector<128x1xf32>
    %cst_13 = arith.constant 1.280000e+02 : f32
    %29 = vector.broadcast %cst_13 : f32 to vector<128x1xf32>
    %30 = arith.divf %28, %29 : vector<128x1xf32>
    %cst_14 = arith.constant 9.99999974E-6 : f32
    %31 = vector.broadcast %cst_14 : f32 to vector<128x1xf32>
    %32 = arith.addf %30, %31 : vector<128x1xf32>
    %33 = math.rsqrt %32 : vector<128x1xf32>
    %34 = vector.broadcast %33 : vector<128x1xf32> to vector<128x128xf32>
    %35 = arith.mulf %25, %34 : vector<128x128xf32>
    %c0_15 = arith.constant 0 : index
    %c0_16 = arith.constant 0 : index
    %36 = vector.load %arg4[%c0_15, %c0_16] : memref<1x128xf32, #tpu.memory_space<vmem>>, vector<1x128xf32>
    %37 = vector.broadcast %36 : vector<1x128xf32> to vector<128x128xf32>
    %38 = arith.mulf %37, %35 : vector<128x128xf32>
    %c0_17 = arith.constant 0 : index
    %c0_18 = arith.constant 0 : index
    %39 = vector.load %arg5[%c0_17, %c0_18] : memref<1x128xf32, #tpu.memory_space<vmem>>, vector<1x128xf32>
    %40 = vector.broadcast %39 : vector<1x128xf32> to vector<128x128xf32>
    %41 = arith.addf %38, %40 : vector<128x128xf32>
    %42 = arith.truncf %41 : vector<128x128xf32> to vector<128x128xbf16>
    %c0_19 = arith.constant 0 : index
    %c0_20 = arith.constant 0 : index
    %43 = vector.load %arg6[%c0_19, %c0_20] : memref<128x128xbf16, #tpu.memory_space<vmem>>, vector<128x128xbf16>
    tpu.vector_store %arg6[%c0_19, %c0_20], %42 {strides = array<i32>} : memref<128x128xbf16, #tpu.memory_space<vmem>>, vector<128x128xbf16>,
    return
  }
  func.func @transform_0(%arg0: i32) -> (i32, i32) {
    %c0_i32 = arith.constant 0 : i32
    %c0_i32_0 = arith.constant 0 : i32
    return %arg0, %c0_i32 : i32, i32
  }
  func.func @transform_1(%arg0: i32) -> (i32, i32) {
    %c0_i32 = arith.constant 0 : i32
    %c0_i32_0 = arith.constant 0 : i32
    %c0_i32_1 = arith.constant 0 : i32
    return %c0_i32, %c0_i32_0 : i32, i32
  }
  func.func @transform_2(%arg0: i32) -> (i32, i32) {
    %c0_i32 = arith.constant 0 : i32
    %c0_i32_0 = arith.constant 0 : i32
    %c0_i32_1 = arith.constant 0 : i32
    return %c0_i32, %c0_i32_0 : i32, i32
  }
  func.func @transform_3(%arg0: i32) -> (i32, i32) {
    %c0_i32 = arith.constant 0 : i32
    %c0_i32_0 = arith.constant 0 : i32
    %c0_i32_1 = arith.constant 0 : i32
    return %c0_i32, %c0_i32_0 : i32, i32
  }
  func.func @transform_4(%arg0: i32) -> (i32, i32) {
    %c0_i32 = arith.constant 0 : i32
    %c0_i32_0 = arith.constant 0 : i32
    %c0_i32_1 = arith.constant 0 : i32
    return %c0_i32, %c0_i32_0 : i32, i32
  }
  func.func @transform_5(%arg0: i32) -> (i32, i32) {
    %c0_i32 = arith.constant 0 : i32
    %c0_i32_0 = arith.constant 0 : i32
    return %arg0, %c0_i32 : i32, i32
  }
}

</mosaic_0001>

<bundles_post_ra>
// kernel: bert_pretraining_heads_forward.3
= control target key start
LH: loop header
LB: loop body
LE: loop exit
PB: predicated region body
PF: predicated region fallthrough
CT: control target
= control target key end

     0   :  { %8 = vsyncpa [#allocation3], 0  ;;  %s1096_s0 = inlined_call_operand.vmem [shape: bf16[128,128], index: 0, kind: input, shape index: {}]   ;;  %s1097_s1 = inlined_call_operand.hbm [shape: bf16[128,384], index: 1, kind: input, shape index: {}]   ;;  %s1098_s2 = inlined_call_operand.vmem [shape: f32[1,384], index: 2, kind: input, shape index: {}]   ;;  %s1099_s3 = inlined_call_operand.vmem [shape: f32[128,384], index: 3, kind: output, shape index: {}]  }
   0x1   :  { %10 = vsyncpa [#allocation3 + $0x1], 0  ;;  %s917_s12 = smov 0   ;;  %s919_s13 = smov 0  }
   0x2   :  { %s921_s14 = smov 0   ;;  %s923_s15 = smov 0  }
   0x3   :  { %s925_s16 = smov 0   ;;  %s927_s17 = smov 0  }
   0x4 LB: > { %s635_s18 = sadd.s32 4294967295, %s892_s17   ;;  %s28_s19 = sadd.s32 1, %s888_s16  ;;  %s892_s17 = sphi %s927_s17, %s16_s17   ;;  %s888_s16 = sphi %s925_s16, %s1107_s16   ;;  %s884_s15 = sphi %s923_s15, %s1106_s15   ;;  %s880_s14 = sphi %s921_s14, %s1105_s14   ;;  %s876_s13 = sphi %s919_s13, %s1104_s13   ;;  %s872_s12 = sphi %s917_s12, %s1103_s12  }
   0x5   : > { %p30_p0 = scmp.ge.s32.totalorder %s28_s19, 3  ;;  %s61_s20 = sadd.s32 1, %s880_s14 }
   0x6   : > { %p68_p1 = scmp.ne.s32.totalorder %s880_s14, %s876_s13  ;;  %p69_p2 = scmp.eq.s32.totalorder %s892_s17, 0 }
   0x7   : > { %s1109_s19 = smov (%p30_p0, %s28_s19), 0  ;;  %p74_p4 = scmp.ne.s32.totalorder %s876_s13, %s872_s12 }
   0x8   : > { %p953_p3 = por %p69_p2, %p68_p1  ;;  %s58_s22 = ssub.s32 %s888_s16, %s1109_s19 }
   0x9   : > { %p75_p5 = scmp.eq.s32.totalorder %s635_s18, 0  ;;  %p59_p6 = scmp.eq.s32.totalorder %s58_s22, 0 }
   0xa   : > { %p126_p7 = scmp.eq.s32.totalorder %s635_s18, 2  ;;  %p759_p10 = scmp.lt.s32.totalorder %s892_s17, 3 }
   0xb   : > { %p960_p8 = por %p75_p5, %p74_p4  ;;  %s161_s26 = sand.u32 1, %s880_s14  }
   0xc   : > { %s965_s24 = scalar_select %p59_p6, %s880_s14, %s61_s20  }
   0xd   : > { %p967_p9 = por %p126_p7, %p68_p1  ;;  %s641_s27 = sshll.u32 %s888_s16, 2 }
   0xe   : > { %s640_s28 = sshll.u32 %s161_s26, 6  ;;  %s169_s4 = scalar_lea.hbm %s1097_s1, %s641_s27 }
   0xf   : > { %s170_s5 = sshll.u32 %s169_s4, 4  ;;  %s165_s6 = scalar_lea.vmem [#allocation2], %s640_s28  ;;  %s171_s5 = int_to_ptr.hbm [resolvable:$true] %s170_s5 }
  0x10   : > { %s172_s7 = sshll.u32 %s165_s6, 4  ;;  %p756_p11 = pnand %p759_p10, %p953_p3  ;;  %s173_s7 = int_to_ptr.vmem [resolvable:$true] %s172_s7 }
  0x11   : > { %p642_p12 = scmp.ge.s32.totalorder %s892_s17, 1  ;;  %s162_s8 = scalar_lea.sflag [#allocation3], %s161_s26 }
  0x12   : > { %s894_s9 = smov 192   ;;  %s895_s10 = smov 64  }
  0x13   : > { %s896_s11 = smov 4   ;;  %p186_p13 = scmp.lt.s32.totalorder %s892_s17, 4 }
  0x14   : > { %758 = dma.hbm_to_vmem [thread:$0]  (!%p756_p11), %s171_s5, 1024, %s173_s7, %s162_s8, %s894_s9, %s895_s10, %s896_s11  }
  0x15   : > { %p187_p0 = pnand %p642_p12, %p186_p13 }
  0x16   : > { %s982_s12 = sand.u32 (!%p187_p0), 1, %s876_s13  }
  0x17   : > { %190 = sbr.rel (%p187_p0) target bundleno = 230 (0xe6), region = 32  ;;  %s643_s18 = sshll.u32 (!%p187_p0), %s982_s12, 6 }
  0x18   : > { %s193_s20 = scalar_lea.sflag (!%p187_p0), [#allocation3], %s982_s12  ;;  %s986_s22 = scalar_lea.vmem (!%p187_p0), [#allocation2], %s643_s18 }
  0x1c   : > { %867 = dma.done.wait (%p960_p8), %s193_s20, 1024  }
  0x1d   : > { %869 = vsyncadd (%p960_p8), %s193_s20, 4294966272  ;;  %p233_p1 = scmp.lt.s32.totalorder %s884_s15, 2  ;;  %v728_v0 = vld [vmem:[%s986_s22 + $0x38] sm:$0xff]  ;;  %v727_v1 = vld [vmem:[%s986_s22 + $0x30] sm:$0xff]  ;;  %s644_s28 = sshll.u32 %s982_s12, 7 }
  0x1e   : > { %369 = vmatpush.bf16.msra.mxu0 %v728_v0  ;;  %729 = vmatpush.bf16.msra.mxu1 %v728_v0  ;;  %v726_v2 = vld [vmem:[%s986_s22 + $0x28] sm:$0xff]  ;;  %v725_v3 = vld [vmem:[%s986_s22 + $0x20] sm:$0xff]  ;;  %v724_v4 = vld [vmem:[%s986_s22 + $0x18] sm:$0xff]  ;;  %s1038_s4 = scalar_lea.vmem [#allocation4], %s644_s28  ;;  %s710_s12 = sshll.u32 (%p967_p9), %s884_s15, 3 }
  0x1f   : > { %s994_s21 = scalar_select %p233_p1, %s884_s15, 2  ;;  %730 = vmatpush.bf16.msra.mxu2 %v728_v0  ;;  %731 = vmatpush.bf16.msra.mxu3 %v728_v0  ;;  %v723_v5 = vld [vmem:[%s986_s22 + $0x10] sm:$0xff]  ;;  %v722_v6 = vld [vmem:[%s986_s22 + $0x8] sm:$0xff]  ;;  %v721_v7 = vld [vmem:[%s986_s22] sm:$0xff] }
  0x20   : > { %v713_v8 = vld [vmem:[%s1096_s0] sm:$0xff]  ;;  %v715_v9 = vld [vmem:[%s1096_s0 + $0x10] sm:$0xff]  ;;  %v714_v12 = vld [vmem:[%s1096_s0 + $0x8] sm:$0xff]  ;;  %s445_s5 = scalar_lea.vmem (%p967_p9), %s1099_s3, %s710_s12 }
  0x21   : > { %s235_s27 = scalar_lea.vmem %s1098_s2, %s994_s21  ;;  %v717_v10 = vld [vmem:[%s1096_s0 + $0x20] sm:$0xff]  ;;  %v719_v11 = vld [vmem:[%s1096_s0 + $0x30] sm:$0xff]  ;;  %v716_v13 = vld [vmem:[%s1096_s0 + $0x18] sm:$0xff] }
  0x22   : > { %370 = vmatpush.bf16.msra.mxu0 %v727_v1  ;;  %732 = vmatpush.bf16.msra.mxu1 %v727_v1  ;;  %v718_v14 = vld [vmem:[%s1096_s0 + $0x28] sm:$0xff]  ;;  %v720_v15 = vld [vmem:[%s1096_s0 + $0x38] sm:$0xff]  ;;  %v811_v16 = vld [vmem:[%s235_s27] ss:$0 sm:$0xff] }
  0x23   : > { %733 = vmatpush.bf16.msra.mxu2 %v727_v1  ;;  %734 = vmatpush.bf16.msra.mxu3 %v727_v1 }
  0x26   : > { %371 = vmatpush.bf16.msra.mxu0 %v726_v2  ;;  %735 = vmatpush.bf16.msra.mxu1 %v726_v2 }
  0x27   : > { %736 = vmatpush.bf16.msra.mxu2 %v726_v2  ;;  %737 = vmatpush.bf16.msra.mxu3 %v726_v2 }
  0x2a   : > { %372 = vmatpush.bf16.msra.mxu0 %v725_v3  ;;  %738 = vmatpush.bf16.msra.mxu1 %v725_v3 }
  0x2b   : > { %739 = vmatpush.bf16.msra.mxu2 %v725_v3  ;;  %740 = vmatpush.bf16.msra.mxu3 %v725_v3 }
  0x2e   : > { %373 = vmatpush.bf16.msra.mxu0 %v724_v4  ;;  %741 = vmatpush.bf16.msra.mxu1 %v724_v4 }
  0x2f   : > { %742 = vmatpush.bf16.msra.mxu2 %v724_v4  ;;  %743 = vmatpush.bf16.msra.mxu3 %v724_v4 }
  0x32   : > { %374 = vmatpush.bf16.msra.mxu0 %v723_v5  ;;  %744 = vmatpush.bf16.msra.mxu1 %v723_v5 }
  0x33   : > { %745 = vmatpush.bf16.msra.mxu2 %v723_v5  ;;  %746 = vmatpush.bf16.msra.mxu3 %v723_v5 }
  0x36   : > { %375 = vmatpush.bf16.msra.mxu0 %v722_v6  ;;  %747 = vmatpush.bf16.msra.mxu1 %v722_v6 }
  0x37   : > { %748 = vmatpush.bf16.msra.mxu2 %v722_v6  ;;  %749 = vmatpush.bf16.msra.mxu3 %v722_v6 }
  0x3a   : > { %376 = vmatpush.bf16.msra.mxu0 %v721_v7  ;;  %750 = vmatpush.bf16.msra.mxu1 %v721_v7 }
  0x3b   : > { %751 = vmatpush.bf16.msra.mxu2 %v721_v7  ;;  %752 = vmatpush.bf16.msra.mxu3 %v721_v7 }
  0x3d   : > { %377 = vmatmul.bf16.vlgmr.msra.gmra.mxu0 %v713_v8  ;;  %387 = vmatmul.bf16.vlgmr.msra.gmra.mxu1 %v715_v9 }
  0x3e   : > { %397 = vmatmul.bf16.vlgmr.msra.gmra.mxu2 %v717_v10  ;;  %407 = vmatmul.bf16.vlgmr.msra.gmra.mxu3 %v719_v11 }
  0x4d   : > { %382 = vmatmul.bf16.gmra.mxu0 %v714_v12  ;;  %392 = vmatmul.bf16.gmra.mxu1 %v716_v13 }
  0x4e   : > { %402 = vmatmul.bf16.gmra.mxu2 %v718_v14  ;;  %412 = vmatmul.bf16.gmra.mxu3 %v720_v15 }
  0xba   : > { %v378_v17 = vpop.f32.mrf.mxu0  ;;  %v388_v18 = vpop.f32.mrf.mxu1 }
  0xbb   : > { %v379_v19 = vadd.f32 %v811_v16, %v378_v17  ;;  %v389_v20 = vadd.f32 %v811_v16, %v388_v18 }
  0xbd   : > { %418 = vst [vmem:[%s1038_s4] sm:$0xff] %v379_v19 }
  0xbe   : > { %422 = vst [vmem:[%s1038_s4 + $0x20] sm:$0xff] %v389_v20 }
  0xc1   : > { %v398_v21 = vpop.f32.mrf.mxu2  ;;  %v408_v22 = vpop.f32.mrf.mxu3 }
  0xc2   : > { %v399_v23 = vadd.f32 %v811_v16, %v398_v21  ;;  %v409_v24 = vadd.f32 %v811_v16, %v408_v22  ;;  %v380_v25 = vpop.f32.mrf.mxu0  ;;  %v390_v26 = vpop.f32.mrf.mxu1 }
  0xc3   : > { %v381_v27 = vadd.f32 %v811_v16, %v380_v25  ;;  %v391_v28 = vadd.f32 %v811_v16, %v390_v26 }
  0xc4   : > { %426 = vst [vmem:[%s1038_s4 + $0x40] sm:$0xff] %v399_v23  ;;  %v504_v49 = vld [vmem:[%s1038_s4] sm:$0xff] (%p967_p9) }
  0xc5   : > { %430 = vst [vmem:[%s1038_s4 + $0x60] sm:$0xff] %v409_v24  ;;  %v512_v53 = vld [vmem:[%s1038_s4 + $0x20] sm:$0xff] (%p967_p9) }
  0xc6   : > { %419 = vst [vmem:[%s1038_s4 + $0x8] sm:$0xff] %v381_v27 }
  0xc7   : > { %423 = vst [vmem:[%s1038_s4 + $0x28] sm:$0xff] %v391_v28 }
  0xc8   : > { %505 = vst [vmem:[%s445_s5] sm:$0xff] (%p967_p9), %v504_v49 }
  0xc9   : > { %v400_v29 = vpop.f32.mrf.mxu2  ;;  %v410_v30 = vpop.f32.mrf.mxu3  ;;  %513 = vst [vmem:[%s445_s5 + $0x60] sm:$0xff] (%p967_p9), %v512_v53 }
  0xca   : > { %v401_v31 = vadd.f32 %v811_v16, %v400_v29  ;;  %v411_v32 = vadd.f32 %v811_v16, %v410_v30  ;;  %v383_v33 = vpop.f32.mrf.mxu0  ;;  %v393_v34 = vpop.f32.mrf.mxu1 }
  0xcb   : > { %v384_v35 = vadd.f32 %v811_v16, %v383_v33  ;;  %v394_v36 = vadd.f32 %v811_v16, %v393_v34  ;;  %v520_v57 = vld [vmem:[%s1038_s4 + $0x40] sm:$0xff] (%p967_p9) }
  0xcc   : > { %427 = vst [vmem:[%s1038_s4 + $0x48] sm:$0xff] %v401_v31  ;;  %v528_v61 = vld [vmem:[%s1038_s4 + $0x60] sm:$0xff] (%p967_p9) }
  0xcd   : > { %431 = vst [vmem:[%s1038_s4 + $0x68] sm:$0xff] %v411_v32  ;;  %v506_v50 = vld [vmem:[%s1038_s4 + $0x8] sm:$0xff] (%p967_p9) }
  0xce   : > { %420 = vst [vmem:[%s1038_s4 + $0x10] sm:$0xff] %v384_v35  ;;  %v514_v54 = vld [vmem:[%s1038_s4 + $0x28] sm:$0xff] (%p967_p9) }
  0xcf   : > { %424 = vst [vmem:[%s1038_s4 + $0x30] sm:$0xff] %v394_v36 }
  0xd0   : > { %507 = vst [vmem:[%s445_s5 + $0x18] sm:$0xff] (%p967_p9), %v506_v50 }
  0xd1   : > { %v403_v37 = vpop.f32.mrf.mxu2  ;;  %v413_v38 = vpop.f32.mrf.mxu3  ;;  %515 = vst [vmem:[%s445_s5 + $0x78] sm:$0xff] (%p967_p9), %v514_v54 }
  0xd2   : > { %v404_v39 = vadd.f32 %v811_v16, %v403_v37  ;;  %v414_v40 = vadd.f32 %v811_v16, %v413_v38  ;;  %v385_v41 = vpop.f32.mrf.mxu0  ;;  %v395_v42 = vpop.f32.mrf.mxu1  ;;  %521 = vst [vmem:[%s445_s5 + $0xc0] sm:$0xff] (%p967_p9), %v520_v57 }
  0xd3   : > { %v386_v43 = vadd.f32 %v811_v16, %v385_v41  ;;  %v396_v44 = vadd.f32 %v811_v16, %v395_v42  ;;  %v522_v58 = vld [vmem:[%s1038_s4 + $0x48] sm:$0xff] (%p967_p9)  ;;  %529 = vst [vmem:[%s445_s5 + $0x120] sm:$0xff] (%p967_p9), %v528_v61 }
  0xd4   : > { %428 = vst [vmem:[%s1038_s4 + $0x50] sm:$0xff] %v404_v39  ;;  %v530_v62 = vld [vmem:[%s1038_s4 + $0x68] sm:$0xff] (%p967_p9) }
  0xd5   : > { %432 = vst [vmem:[%s1038_s4 + $0x70] sm:$0xff] %v414_v40  ;;  %v508_v51 = vld [vmem:[%s1038_s4 + $0x10] sm:$0xff] (%p967_p9) }
  0xd6   : > { %421 = vst [vmem:[%s1038_s4 + $0x18] sm:$0xff] %v386_v43  ;;  %v516_v55 = vld [vmem:[%s1038_s4 + $0x30] sm:$0xff] (%p967_p9) }
  0xd7   : > { %425 = vst [vmem:[%s1038_s4 + $0x38] sm:$0xff] %v396_v44 }
  0xd8   : > { %509 = vst [vmem:[%s445_s5 + $0x30] sm:$0xff] (%p967_p9), %v508_v51 }
  0xd9   : > { %v405_v45 = vpop.f32.mrf.mxu2  ;;  %v415_v46 = vpop.f32.mrf.mxu3  ;;  %440 = sbr.rel (!%p967_p9) target bundleno = 230 (0xe6), region = 40  ;;  %517 = vst [vmem:[%s445_s5 + $0x90] sm:$0xff] (%p967_p9), %v516_v55 }
  0xda   : > { %v406_v47 = vadd.f32 %v811_v16, %v405_v45  ;;  %v416_v48 = vadd.f32 %v811_v16, %v415_v46  ;;  %523 = vst [vmem:[%s445_s5 + $0xd8] sm:$0xff] (%p967_p9), %v522_v58 }
  0xdb   : > { %v524_v59 = vld [vmem:[%s1038_s4 + $0x50] sm:$0xff] (%p967_p9)  ;;  %531 = vst [vmem:[%s445_s5 + $0x138] sm:$0xff] (%p967_p9), %v530_v62 }
  0xdc   : > { %429 = vst [vmem:[%s1038_s4 + $0x58] sm:$0xff] %v406_v47  ;;  %v532_v63 = vld [vmem:[%s1038_s4 + $0x70] sm:$0xff] (%p967_p9) }
  0xdd   : > { %433 = vst [vmem:[%s1038_s4 + $0x78] sm:$0xff] %v416_v48  ;;  %v510_v52 = vld [vmem:[%s1038_s4 + $0x18] sm:$0xff] (%p967_p9) }
  0xde   : > { %511 = vst [vmem:[%s445_s5 + $0x48] sm:$0xff] %v510_v52  ;;  %v518_v56 = vld [vmem:[%s1038_s4 + $0x38] sm:$0xff] }
  0xdf   : > { %519 = vst [vmem:[%s445_s5 + $0xa8] sm:$0xff] %v518_v56 }
  0xe0   : > { %525 = vst [vmem:[%s445_s5 + $0xf0] sm:$0xff] %v524_v59 }
  0xe1   : > { %533 = vst [vmem:[%s445_s5 + $0x150] sm:$0xff] %v532_v63 }
  0xe3   : > { %v526_v60 = vld [vmem:[%s1038_s4 + $0x58] sm:$0xff] }
  0xe4   : > { %527 = vst [vmem:[%s445_s5 + $0x108] sm:$0xff] %v526_v60  ;;  %v534_v0 = vld [vmem:[%s1038_s4 + $0x78] sm:$0xff] }
  0xe5   : > { %535 = vst [vmem:[%s445_s5 + $0x168] sm:$0xff] %v534_v0 }
  0xe6 PF: > { %s16_s17 = sadd.s32 1, %s892_s17   ;;  %s1103_s12 = smov %s876_s13 }
  0xe7   : > { %p13_p2 = scmp.ge.s32.totalorder %s16_s17, 5   ;;  %s1104_s13 = smov %s880_s14 }
  0xe8   : > { %s1105_s14 = smov %s965_s24  ;;  %s1106_s15 = smov %s888_s16 }
  0xe9   : > { %s1107_s16 = smov %s1109_s19  ;;  %15 = sbr.rel (!%p13_p2) target bundleno = 4 (0x4), region = 116 }
  0xee   :  { %551 = vsyncpa [#allocation3], 1 }
  0xef   :  { %553 = vsyncpa [#allocation3 + $0x1], 1 }

// kernel: bert_pretraining_heads_forward.2
= control target key start
LH: loop header
LB: loop body
LE: loop exit
PB: predicated region body
PF: predicated region fallthrough
CT: control target
= control target key end

     0   :  { %s1546_s1 = inlined_call_operand.vmem [shape: bf16[128,128], index: 1, kind: input, shape index: {}]   ;;  %s1547_s2 = inlined_call_operand.vmem [shape: f32[1,128], index: 2, kind: input, shape index: {}]   ;;  %s1548_s0 = inlined_call_operand.vmem [shape: bf16[128,128], index: 0, kind: input, shape index: {}]   ;;  %s1549_s3 = inlined_call_operand.vmem [shape: f32[1,128], index: 3, kind: input, shape index: {}]   ;;  %s1550_s4 = inlined_call_operand.vmem [shape: f32[1,128], index: 4, kind: input, shape index: {}]   ;;  %s1551_s5 = inlined_call_operand.vmem [shape: bf16[128,128], index: 5, kind: output, shape index: {}]  }
   0x1   :  { %v827_v0 = vld [vmem:[%s1546_s1 + $0x38] sm:$0xff]  ;;  %v826_v1 = vld [vmem:[%s1546_s1 + $0x30] sm:$0xff]  ;;  %v825_v2 = vld [vmem:[%s1546_s1 + $0x28] sm:$0xff] }
   0x2   :  { %152 = vmatpush.bf16.msra.mxu0 %v827_v0  ;;  %875 = vmatpush.bf16.msra.mxu1 %v827_v0  ;;  %v824_v3 = vld [vmem:[%s1546_s1 + $0x20] sm:$0xff]  ;;  %v823_v4 = vld [vmem:[%s1546_s1 + $0x18] sm:$0xff]  ;;  %v822_v5 = vld [vmem:[%s1546_s1 + $0x10] sm:$0xff] }
   0x3   :  { %876 = vmatpush.bf16.msra.mxu2 %v827_v0  ;;  %877 = vmatpush.bf16.msra.mxu3 %v827_v0  ;;  %v821_v6 = vld [vmem:[%s1546_s1 + $0x8] sm:$0xff]  ;;  %v820_v7 = vld [vmem:[%s1546_s1] sm:$0xff]  ;;  %v814_v9 = vld [vmem:[%s1548_s0 + $0x10] sm:$0xff] }
   0x4   :  { %v812_v8 = vld [vmem:[%s1548_s0] sm:$0xff]  ;;  %v818_v11 = vld [vmem:[%s1548_s0 + $0x30] sm:$0xff]  ;;  %v813_v12 = vld [vmem:[%s1548_s0 + $0x8] sm:$0xff] }
   0x5   :  { %v816_v10 = vld [vmem:[%s1548_s0 + $0x20] sm:$0xff]  ;;  %v815_v13 = vld [vmem:[%s1548_s0 + $0x18] sm:$0xff]  ;;  %v817_v14 = vld [vmem:[%s1548_s0 + $0x28] sm:$0xff] }
   0x6   :  { %153 = vmatpush.bf16.msra.mxu0 %v826_v1  ;;  %878 = vmatpush.bf16.msra.mxu1 %v826_v1  ;;  %v819_v15 = vld [vmem:[%s1548_s0 + $0x38] sm:$0xff]  ;;  %v1051_v16 = vld [vmem:[%s1547_s2] ss:$0 sm:$0xff] }
   0x7   :  { %879 = vmatpush.bf16.msra.mxu2 %v826_v1  ;;  %880 = vmatpush.bf16.msra.mxu3 %v826_v1 }
   0xa   :  { %154 = vmatpush.bf16.msra.mxu0 %v825_v2  ;;  %881 = vmatpush.bf16.msra.mxu1 %v825_v2 }
   0xb   :  { %882 = vmatpush.bf16.msra.mxu2 %v825_v2  ;;  %883 = vmatpush.bf16.msra.mxu3 %v825_v2 }
   0xe   :  { %155 = vmatpush.bf16.msra.mxu0 %v824_v3  ;;  %884 = vmatpush.bf16.msra.mxu1 %v824_v3 }
   0xf   :  { %885 = vmatpush.bf16.msra.mxu2 %v824_v3  ;;  %886 = vmatpush.bf16.msra.mxu3 %v824_v3 }
  0x12   :  { %156 = vmatpush.bf16.msra.mxu0 %v823_v4  ;;  %887 = vmatpush.bf16.msra.mxu1 %v823_v4 }
  0x13   :  { %888 = vmatpush.bf16.msra.mxu2 %v823_v4  ;;  %889 = vmatpush.bf16.msra.mxu3 %v823_v4 }
  0x16   :  { %157 = vmatpush.bf16.msra.mxu0 %v822_v5  ;;  %890 = vmatpush.bf16.msra.mxu1 %v822_v5 }
  0x17   :  { %891 = vmatpush.bf16.msra.mxu2 %v822_v5  ;;  %892 = vmatpush.bf16.msra.mxu3 %v822_v5 }
  0x1a   :  { %158 = vmatpush.bf16.msra.mxu0 %v821_v6  ;;  %893 = vmatpush.bf16.msra.mxu1 %v821_v6 }
  0x1b   :  { %894 = vmatpush.bf16.msra.mxu2 %v821_v6  ;;  %895 = vmatpush.bf16.msra.mxu3 %v821_v6 }
  0x1e   :  { %159 = vmatpush.bf16.msra.mxu0 %v820_v7  ;;  %896 = vmatpush.bf16.msra.mxu1 %v820_v7 }
  0x1f   :  { %897 = vmatpush.bf16.msra.mxu2 %v820_v7  ;;  %898 = vmatpush.bf16.msra.mxu3 %v820_v7 }
  0x21   :  { %160 = vmatmul.bf16.vlgmr.msra.gmra.mxu0 %v812_v8  ;;  %170 = vmatmul.bf16.vlgmr.msra.gmra.mxu1 %v814_v9 }
  0x22   :  { %180 = vmatmul.bf16.vlgmr.msra.gmra.mxu2 %v816_v10  ;;  %190 = vmatmul.bf16.vlgmr.msra.gmra.mxu3 %v818_v11 }
  0x31   :  { %165 = vmatmul.bf16.gmra.mxu0 %v813_v12  ;;  %175 = vmatmul.bf16.gmra.mxu1 %v815_v13 }
  0x32   :  { %185 = vmatmul.bf16.gmra.mxu2 %v817_v14  ;;  %195 = vmatmul.bf16.gmra.mxu3 %v819_v15 }
  0x9e   :  { %v161_v17 = vpop.f32.mrf.mxu0  ;;  %v171_v18 = vpop.f32.mrf.mxu1 }
  0x9f   :  { %v162_v19 = vadd.f32 %v1051_v16, %v161_v17  ;;  %v172_v20 = vadd.f32 %v1051_v16, %v171_v18 }
  0xa1   :  { %v233_v21 = vmul.f32 0.044715, %v162_v19  ;;  %v237_v22 = vmul.f32 0.044715, %v172_v20  ;;  %v221_v23 = vmul.f32 0.7978846, %v172_v20 }
  0xa2   :  { %v217_v25 = vmul.f32 0.7978846, %v162_v19  ;;  %v205_v54 = vmul.f32 0.5, %v172_v20  ;;  %v201_v63 = vmul.f32 0.5, %v162_v19 }
  0xa3   :  { %v253_v24 = vmul.f32 %v237_v22, %v172_v20  ;;  %v249_v26 = vmul.f32 %v233_v21, %v162_v19 }
  0xa5   :  { %v181_v27 = vpop.f32.mrf.mxu2  ;;  %v191_v28 = vpop.f32.mrf.mxu3  ;;  %v269_v29 = vadd.f32 1.0, %v253_v24  ;;  %v265_v30 = vadd.f32 1.0, %v249_v26 }
  0xa6   :  { %v182_v31 = vadd.f32 %v1051_v16, %v181_v27  ;;  %v1057_v32 = vadd.f32 %v1051_v16, %v191_v28  ;;  %v163_v33 = vpop.f32.mrf.mxu0  ;;  %v173_v34 = vpop.f32.mrf.mxu1 }
  0xa7   :  { %v1060_v35 = vadd.f32 %v1051_v16, %v163_v33  ;;  %v1063_v36 = vadd.f32 %v1051_v16, %v173_v34  ;;  %v285_v37 = vmul.f32 %v269_v29, %v221_v23  ;;  %v281_v38 = vmul.f32 %v265_v30, %v217_v25 }
  0xa8   :  { %v241_v39 = vmul.f32 0.044715, %v182_v31  ;;  %v245_v40 = vmul.f32 0.044715, %v1057_v32  ;;  %v225_v43 = vmul.f32 0.7978846, %v182_v31 }
  0xa9   :  { %v234_v41 = vmul.f32 0.044715, %v1060_v35  ;;  %v238_v42 = vmul.f32 0.044715, %v1063_v36  ;;  %903 = vtanh.f32 %v285_v37  ;;  %v229_v46 = vmul.f32 0.7978846, %v1057_v32 }
  0xaa   :  { %905 = vtanh.f32 %v281_v38  ;;  %v257_v44 = vmul.f32 %v241_v39, %v182_v31  ;;  %v261_v45 = vmul.f32 %v245_v40, %v1057_v32  ;;  %v222_v50 = vmul.f32 0.7978846, %v1063_v36 }
  0xab   :  { %v254_v47 = vmul.f32 %v238_v42, %v1063_v36  ;;  %v250_v51 = vmul.f32 %v234_v41, %v1060_v35  ;;  %v218_v0 = vmul.f32 0.7978846, %v1060_v35  ;;  %v209_v21 = vmul.f32 0.5, %v182_v31 }
  0xac   :  { %v273_v48 = vadd.f32 1.0, %v257_v44  ;;  %v277_v49 = vadd.f32 1.0, %v261_v45  ;;  %v213_v40 = vmul.f32 0.5, %v1057_v32 }
  0xad   :  { %v183_v52 = vpop.f32.mrf.mxu2  ;;  %v193_v53 = vpop.f32.mrf.mxu3  ;;  %v270_v55 = vadd.f32 1.0, %v254_v47  ;;  %v266_v1 = vadd.f32 1.0, %v250_v51 }
  0xae   :  { %v1074_v56 = vadd.f32 %v1051_v16, %v183_v52  ;;  %v194_v57 = vadd.f32 %v1051_v16, %v193_v53  ;;  %v166_v58 = vpop.f32.mrf.mxu0  ;;  %v289_v59 = vmul.f32 %v273_v48, %v225_v43  ;;  %v293_v60 = vmul.f32 %v277_v49, %v229_v46  ;;  %v176_v4 = vpop.f32.mrf.mxu1 }
  0xaf   :  { %v904_v61 = vpop.eup %903  ;;  %v1078_v62 = vadd.f32 %v1051_v16, %v166_v58  ;;  %v286_v6 = vmul.f32 %v270_v55, %v222_v50  ;;  %v1086_v12 = vadd.f32 %v1051_v16, %v176_v4  ;;  %v282_v14 = vmul.f32 %v266_v1, %v218_v0 }
  0xb0   :  { %v906_v2 = vpop.eup %905  ;;  %v246_v3 = vmul.f32 0.044715, %v194_v57  ;;  %v317_v5 = vadd.f32 1.0, %v904_v61  ;;  %907 = vtanh.f32 %v289_v59  ;;  %v242_v7 = vmul.f32 0.044715, %v1074_v56 }
  0xb1   :  { %v235_v8 = vmul.f32 0.044715, %v1078_v62  ;;  %v313_v9 = vadd.f32 1.0, %v906_v2  ;;  %909 = vtanh.f32 %v293_v60  ;;  %v230_v15 = vmul.f32 0.7978846, %v194_v57 }
  0xb2   :  { %v1083_v10 = vmul.f32 %v317_v5, %v205_v54  ;;  %v262_v11 = vmul.f32 %v246_v3, %v194_v57  ;;  %911 = vtanh.f32 %v286_v6  ;;  %v219_v22 = vmul.f32 0.7978846, %v1078_v62 }
  0xb3   :  { %v1088_v13 = vmul.f32 %v313_v9, %v201_v63  ;;  %v251_v18 = vmul.f32 %v235_v8, %v1078_v62  ;;  %v258_v23 = vmul.f32 %v242_v7, %v1074_v56  ;;  %913 = vtanh.f32 %v282_v14 }
  0xb4   :  { %353 = vadd.xlane.f32.xlu2 %v1083_v10  ;;  %v278_v17 = vadd.f32 1.0, %v262_v11  ;;  %v239_v29 = vmul.f32 0.044715, %v1086_v12  ;;  %v226_v39 = vmul.f32 0.7978846, %v1074_v56  ;;  %v214_v51 = vmul.f32 0.5, %v194_v57 }
  0xb5   :  { %v186_v19 = vpop.f32.mrf.mxu2  ;;  %345 = vadd.xlane.f32.xlu0 %v1088_v13  ;;  %v196_v20 = vpop.f32.mrf.mxu3  ;;  %v267_v27 = vadd.f32 1.0, %v251_v18  ;;  %v274_v34 = vadd.f32 1.0, %v258_v23  ;;  %v223_v60 = vmul.f32 0.7978846, %v1086_v12  ;;  %v206_v7 = vmul.f32 0.5, %v1063_v36 }
  0xb6   :  { %v908_v24 = vpop.eup %907  ;;  %v1096_v25 = vadd.f32 %v1051_v16, %v186_v19  ;;  %v294_v26 = vmul.f32 %v278_v17, %v230_v15  ;;  %v1100_v30 = vadd.f32 %v1051_v16, %v196_v20  ;;  %v168_v37 = vpop.f32.mrf.mxu0  ;;  %v255_v52 = vmul.f32 %v239_v29, %v1086_v12 }
  0xb7   :  { %v910_v28 = vpop.eup %909  ;;  %v321_v33 = vadd.f32 1.0, %v908_v24  ;;  %v283_v41 = vmul.f32 %v267_v27, %v219_v22  ;;  %v178_v43 = vpop.f32.mrf.mxu1  ;;  %v290_v45 = vmul.f32 %v274_v34, %v226_v39  ;;  %v1109_v47 = vadd.f32 %v1051_v16, %v168_v37 }
  0xb8   :  { %v243_v31 = vmul.f32 0.044715, %v1096_v25  ;;  %v325_v38 = vadd.f32 1.0, %v910_v28  ;;  %915 = vtanh.f32 %v294_v26  ;;  %v912_v42 = vpop.eup %911  ;;  %v247_v46 = vmul.f32 0.044715, %v1100_v30 }
  0xb9   :  { %v1105_v44 = vmul.f32 %v321_v33, %v209_v21  ;;  %v914_v50 = vpop.eup %913  ;;  %917 = vtanh.f32 %v283_v41  ;;  %v227_v32 = vmul.f32 0.7978846, %v1096_v25  ;;  %v1118_v53 = vadd.f32 %v1051_v16, %v178_v43 }
  0xba   :  { %v1111_v48 = vmul.f32 %v325_v38, %v213_v40  ;;  %v259_v49 = vmul.f32 %v243_v31, %v1096_v25  ;;  %v318_v58 = vadd.f32 1.0, %v912_v42  ;;  %919 = vtanh.f32 %v290_v45 }
  0xbb   :  { %v271_v0 = vadd.f32 1.0, %v255_v52  ;;  %v236_v1 = vmul.f32 0.044715, %v1109_v47  ;;  %v314_v3 = vadd.f32 1.0, %v914_v50  ;;  %v263_v4 = vmul.f32 %v247_v46, %v1100_v30 }
  0xbc   :  { %361 = vadd.xlane.f32.xlu2 %v1105_v44  ;;  %v275_v59 = vadd.f32 1.0, %v259_v49  ;;  %v202_v11 = vmul.f32 0.5, %v1060_v35  ;;  %v240_v15 = vmul.f32 0.044715, %v1118_v53  ;;  %v1134_v17 = vmul.f32 %v318_v58, %v206_v7 }
  0xbd   :  { %v188_v54 = vpop.f32.mrf.mxu2  ;;  %369 = vadd.xlane.f32.xlu0 %v1111_v48  ;;  %v198_v55 = vpop.f32.mrf.mxu3  ;;  %v231_v20 = vmul.f32 0.7978846, %v1100_v30  ;;  %v279_v21 = vadd.f32 1.0, %v263_v4  ;;  %v252_v36 = vmul.f32 %v236_v1, %v1109_v47  ;;  %v220_v29 = vmul.f32 0.7978846, %v1109_v47 }
  0xbe   :  { %v916_v61 = vpop.eup %915  ;;  %v189_v63 = vadd.f32 %v1051_v16, %v188_v54  ;;  %v1124_v57 = vadd.f32 %v1051_v16, %v198_v55  ;;  %v291_v8 = vmul.f32 %v275_v59, %v227_v32  ;;  %v287_v16 = vmul.f32 %v271_v0, %v223_v60 }
  0xbf   :  { %v326_v2 = vadd.f32 1.0, %v916_v61  ;;  %v918_v14 = vpop.eup %917  ;;  %v1137_v19 = vmul.f32 %v314_v3, %v202_v11  ;;  %v268_v27 = vadd.f32 1.0, %v252_v36  ;;  %v203_v31 = vmul.f32 0.5, %v1078_v62 }
  0xc0   :  { %v244_v5 = vmul.f32 0.044715, %v189_v63  ;;  %v248_v6 = vmul.f32 0.044715, %v1124_v57  ;;  %v920_v22 = vpop.eup %919  ;;  %v228_v35 = vmul.f32 0.7978846, %v189_v63  ;;  %921 = vtanh.f32 %v291_v8 }
  0xc1   :  { %v1130_v9 = vmul.f32 %v326_v2, %v214_v51  ;;  %v315_v26 = vadd.f32 1.0, %v918_v14  ;;  %923 = vtanh.f32 %v287_v16  ;;  %v232_v33 = vmul.f32 0.7978846, %v1124_v57 }
  0xc2   :  { %v260_v18 = vmul.f32 %v244_v5, %v189_v63  ;;  %v264_v24 = vmul.f32 %v248_v6, %v1124_v57  ;;  %v322_v37 = vadd.f32 1.0, %v920_v22  ;;  %v295_v38 = vmul.f32 %v279_v21, %v231_v20 }
  0xc3   :  { %371 = vadd.xlane.f32.xlu1 %v1130_v9  ;;  %v284_v39 = vmul.f32 %v268_v27, %v220_v29  ;;  %v256_v40 = vmul.f32 %v240_v15, %v1118_v53  ;;  %v1148_v41 = vmul.f32 %v315_v26, %v203_v31  ;;  %v210_v42 = vmul.f32 0.5, %v1074_v56 }
  0xc4   :  { %355 = vadd.xlane.f32.xlu2 %v1134_v17  ;;  %v276_v23 = vadd.f32 1.0, %v260_v18  ;;  %v280_v34 = vadd.f32 1.0, %v264_v24  ;;  %v224_v62 = vmul.f32 0.7978846, %v1118_v53  ;;  %v207_v52 = vmul.f32 0.5, %v1086_v12 }
  0xc5   :  { %347 = vadd.xlane.f32.xlu0 %v1137_v19  ;;  %v1152_v49 = vmul.f32 %v322_v37, %v210_v42  ;;  %v272_v50 = vadd.f32 1.0, %v256_v40  ;;  %v212_v56 = vmul.f32 0.5, %v189_v63  ;;  %v211_v55 = vmul.f32 0.5, %v1096_v25 }
  0xc6   :  { %v292_v28 = vmul.f32 %v276_v23, %v228_v35  ;;  %v922_v43 = vpop.eup %921  ;;  %v296_v45 = vmul.f32 %v280_v34, %v232_v33  ;;  %v215_v25 = vmul.f32 0.5, %v1100_v30  ;;  %v204_v4 = vmul.f32 0.5, %v1109_v47 }
  0xc7   :  { %v924_v46 = vpop.eup %923  ;;  %v323_v51 = vadd.f32 1.0, %v922_v43  ;;  %v288_v59 = vmul.f32 %v272_v50, %v224_v62  ;;  %v216_v5 = vmul.f32 0.5, %v1124_v57  ;;  %v208_v30 = vmul.f32 0.5, %v1118_v53 }
  0xc8   :  { %925 = vtanh.f32 %v292_v28  ;;  %v319_v58 = vadd.f32 1.0, %v924_v46  ;;  %v969_v57 = vmov 128.0  }
  0xc9   :  { %927 = vtanh.f32 %v295_v38  ;;  %v1160_v0 = vmul.f32 %v323_v51, %v211_v55 }
  0xca   :  { %929 = vtanh.f32 %v284_v39  ;;  %v1164_v2 = vmul.f32 %v319_v58, %v207_v52 }
  0xcb   :  { %349 = vadd.xlane.f32.xlu1 %v1148_v41  ;;  %931 = vtanh.f32 %v296_v45 }
  0xcc   :  { %933 = vtanh.f32 %v288_v59 }
  0xcd   :  { %363 = vadd.xlane.f32.xlu0 %v1152_v49  ;;  %935 = vrcp.f32 %v969_v57 }
  0xce   :  { %v926_v32 = vpop.eup %925 }
  0xcf   :  { %v324_v54 = vadd.f32 1.0, %v926_v32  ;;  %v928_v60 = vpop.eup %927 }
  0xd0   :  { %v930_v1 = vpop.eup %929  ;;  %v327_v63 = vadd.f32 1.0, %v928_v60 }
  0xd1   :  { %v1158_v61 = vmul.f32 %v324_v54, %v212_v56  ;;  %v932_v12 = vpop.eup %931  ;;  %v316_v3 = vadd.f32 1.0, %v930_v1 }
  0xd2   :  { %v328_v6 = vadd.f32 1.0, %v932_v12  ;;  %v1170_v7 = vmul.f32 %v327_v63, %v215_v25  ;;  %v934_v11 = vpop.eup %933 }
  0xd3   :  { %367 = vadd.xlane.f32.xlu2 %v1158_v61  ;;  %365 = vadd.xlane.f32.xlu1 %v1160_v0  ;;  %v1172_v8 = vmul.f32 %v316_v3, %v204_v4  ;;  %v320_v14 = vadd.f32 1.0, %v934_v11  ;;  %v936_v15 = vpop.eup %935 }
  0xd4   :  { %v1176_v16 = vmul.f32 %v328_v6, %v216_v5  ;;  %v378_v18 = vmul.f32 128.0, %v936_v15  ;;  %vm382_vm0 = vweird.f32 %v936_v15 }
  0xd5   :  { %357 = vadd.xlane.f32.xlu0 %v1164_v2  ;;  %v1180_v47 = vmul.f32 %v320_v14, %v208_v30 }
  0xd6   :  { %v379_v20 = vsub.f32 1.0, %v378_v18 }
  0xd8   :  { %v380_v21 = vmul.f32 %v936_v15, %v379_v20 }
  0xda   :  { %v381_v36 = vadd.f32 %v936_v15, %v380_v21 }
  0xdb   :  { %373 = vadd.xlane.f32.xlu2 %v1170_v7  ;;  %351 = vadd.xlane.f32.xlu1 %v1172_v8 }
  0xdc   :  { %v1183_v22 = vsel %vm382_vm0, %v936_v15, %v381_v36 }
  0xdd   :  { %375 = vadd.xlane.f32.xlu0 %v1176_v16 }
  0xe3   :  { %359 = vadd.xlane.f32.xlu1 %v1180_v47 }
 0x127   :  { %v354_v35 = vpop.xlane.xlu2 %353 }
 0x128   :  { %v388_v23 = vmul.f32 %v1183_v22, %v354_v35  ;;  %v346_v24 = vpop.xlane.xlu0 %345 }
 0x129   :  { %v384_v53 = vmul.f32 %v1183_v22, %v346_v24 }
 0x12a   :  { %v1188_v26 = vsub.f32 %v1083_v10, %v388_v23 }
 0x12b   :  { %v1191_v27 = vsub.f32 %v1088_v13, %v384_v53 }
 0x12c   :  { %v420_v28 = vmul.f32 %v1188_v26, %v1188_v26 }
 0x12d   :  { %v416_v29 = vmul.f32 %v1191_v27, %v1191_v27 }
 0x12e   :  { %440 = vadd.xlane.f32.xlu2 %v420_v28 }
 0x12f   :  { %432 = vadd.xlane.f32.xlu1 %v416_v29  ;;  %v362_v33 = vpop.xlane.xlu2 %361 }
 0x130   :  { %v392_v34 = vmul.f32 %v1183_v22, %v362_v33  ;;  %v370_v31 = vpop.xlane.xlu0 %369 }
 0x131   :  { %v396_v37 = vmul.f32 %v1183_v22, %v370_v31 }
 0x132   :  { %v1200_v10 = vsub.f32 %v1105_v44, %v392_v34 }
 0x133   :  { %v1203_v13 = vsub.f32 %v1111_v48, %v396_v37 }
 0x134   :  { %v424_v38 = vmul.f32 %v1200_v10, %v1200_v10 }
 0x135   :  { %v428_v39 = vmul.f32 %v1203_v13, %v1203_v13 }
 0x136   :  { %v372_v40 = vpop.xlane.xlu1 %371  ;;  %448 = vadd.xlane.f32.xlu0 %v424_v38 }
 0x137   :  { %456 = vadd.xlane.f32.xlu1 %v428_v39  ;;  %v356_v42 = vpop.xlane.xlu2 %355  ;;  %v397_v36 = vmul.f32 %v1183_v22, %v372_v40 }
 0x138   :  { %v389_v43 = vmul.f32 %v1183_v22, %v356_v42  ;;  %v348_v45 = vpop.xlane.xlu0 %347 }
 0x139   :  { %v385_v46 = vmul.f32 %v1183_v22, %v348_v45  ;;  %v1277_v24 = vsub.f32 %v1130_v9, %v397_v36 }
 0x13a   :  { %v1212_v44 = vsub.f32 %v1134_v17, %v389_v43 }
 0x13b   :  { %v1215_v48 = vsub.f32 %v1137_v19, %v385_v46 }
 0x13c   :  { %v421_v62 = vmul.f32 %v1212_v44, %v1212_v44 }
 0x13d   :  { %v417_v50 = vmul.f32 %v1215_v48, %v1215_v48 }
 0x13e   :  { %v350_v51 = vpop.xlane.xlu1 %349  ;;  %442 = vadd.xlane.f32.xlu0 %v421_v62 }
 0x13f   :  { %v386_v32 = vmul.f32 %v1183_v22, %v350_v51  ;;  %434 = vadd.xlane.f32.xlu2 %v417_v50 }
 0x140   :  { %v364_v52 = vpop.xlane.xlu0 %363 }
 0x141   :  { %v1223_v56 = vsub.f32 %v1148_v41, %v386_v32  ;;  %v393_v17 = vmul.f32 %v1183_v22, %v364_v52 }
 0x143   :  { %v1227_v19 = vsub.f32 %v1152_v49, %v393_v17  ;;  %v418_v54 = vmul.f32 %v1223_v56, %v1223_v56 }
 0x145   :  { %v425_v55 = vmul.f32 %v1227_v19, %v1227_v19 }
 0x146   :  { %v368_v58 = vpop.xlane.xlu2 %367  ;;  %v366_v59 = vpop.xlane.xlu1 %365  ;;  %436 = vadd.xlane.f32.xlu0 %v418_v54 }
 0x147   :  { %v395_v60 = vmul.f32 %v1183_v22, %v368_v58  ;;  %v394_v1 = vmul.f32 %v1183_v22, %v366_v59  ;;  %450 = vadd.xlane.f32.xlu1 %v425_v55 }
 0x148   :  { %v358_v41 = vpop.xlane.xlu0 %357 }
 0x149   :  { %v1236_v12 = vsub.f32 %v1158_v61, %v395_v60  ;;  %v1239_v49 = vsub.f32 %v1160_v0, %v394_v1  ;;  %v390_v25 = vmul.f32 %v1183_v22, %v358_v41 }
 0x14b   :  { %v1243_v63 = vsub.f32 %v1164_v2, %v390_v25  ;;  %v426_v3 = vmul.f32 %v1239_v49, %v1239_v49  ;;  %v427_v4 = vmul.f32 %v1236_v12, %v1236_v12 }
 0x14d   :  { %452 = vadd.xlane.f32.xlu2 %v426_v3  ;;  %v422_v5 = vmul.f32 %v1243_v63, %v1243_v63 }
 0x14e   :  { %v374_v61 = vpop.xlane.xlu2 %373  ;;  %v352_v6 = vpop.xlane.xlu1 %351  ;;  %454 = vadd.xlane.f32.xlu0 %v427_v4 }
 0x14f   :  { %v398_v0 = vmul.f32 %v1183_v22, %v374_v61  ;;  %v387_v11 = vmul.f32 %v1183_v22, %v352_v6  ;;  %444 = vadd.xlane.f32.xlu1 %v422_v5 }
 0x150   :  { %v376_v14 = vpop.xlane.xlu0 %375 }
 0x151   :  { %v1254_v2 = vsub.f32 %v1170_v7, %v398_v0  ;;  %v1257_v30 = vsub.f32 %v1172_v8, %v387_v11  ;;  %v399_v15 = vmul.f32 %v1183_v22, %v376_v14 }
 0x153   :  { %v430_v57 = vmul.f32 %v1254_v2, %v1254_v2  ;;  %v419_v18 = vmul.f32 %v1257_v30, %v1257_v30  ;;  %v1266_v7 = vsub.f32 %v1176_v16, %v399_v15  ;;  %v429_v16 = vmul.f32 %v1277_v24, %v1277_v24 }
 0x155   :  { %v431_v23 = vmul.f32 %v1266_v7, %v1266_v7 }
 0x156   :  { %v360_v20 = vpop.xlane.xlu1 %359  ;;  %460 = vadd.xlane.f32.xlu0 %v430_v57 }
 0x157   :  { %v391_v21 = vmul.f32 %v1183_v22, %v360_v20  ;;  %438 = vadd.xlane.f32.xlu1 %v419_v18 }
 0x159   :  { %v1269_v8 = vsub.f32 %v1180_v47, %v391_v21 }
 0x15b   :  { %v423_v35 = vmul.f32 %v1269_v8, %v1269_v8 }
 0x15d   :  { %446 = vadd.xlane.f32.xlu2 %v423_v35 }
 0x15f   :  { %462 = vadd.xlane.f32.xlu1 %v431_v23 }
 0x165   :  { %458 = vadd.xlane.f32.xlu2 %v429_v16 }
 0x1a1   :  { %v441_v53 = vpop.xlane.xlu2 %440 }
 0x1a2   :  { %v468_v47 = vmul.f32 %v441_v53, %v1183_v22  ;;  %v433_v28 = vpop.xlane.xlu1 %432 }
 0x1a3   :  { %v464_v29 = vmul.f32 %v433_v28, %v1183_v22 }
 0x1a4   :  { %v484_v33 = vadd.f32 1e-05, %v468_v47 }
 0x1a5   :  { %v480_v34 = vadd.f32 1e-05, %v464_v29 }
 0x1a6   :  { %937 = vrsqrt.f32 %v484_v33  ;;  %vm542_vm3 = vweird.f32 %v484_v33 }
 0x1a7   :  { %939 = vrsqrt.f32 %v480_v34  ;;  %vm502_vm5 = vweird.f32 %v480_v34 }
 0x1a9   :  { %v449_v31 = vpop.xlane.xlu0 %448 }
 0x1aa   :  { %v472_v37 = vmul.f32 %v449_v31, %v1183_v22  ;;  %v457_v50 = vpop.xlane.xlu1 %456 }
 0x1ab   :  { %v476_v11 = vmul.f32 %v457_v50, %v1183_v22 }
 0x1ac   :  { %v938_v9 = vpop.eup %937  ;;  %v1284_v38 = vadd.f32 1e-05, %v472_v37 }
 0x1ad   :  { %v940_v39 = vpop.eup %939  ;;  %v537_v40 = vmul.f32 %v938_v9, %v484_v33  ;;  %vm543_vm1 = vweird.f32 %v938_v9  ;;  %v1322_v47 = vadd.f32 1e-05, %v476_v11  ;;  %v1329_v33 = vld [vmem:[%s1549_s3] ss:$0 sm:$0xff] }
 0x1ae   :  { %v497_v42 = vmul.f32 %v940_v39, %v480_v34  ;;  %941 = vrsqrt.f32 %v1284_v38  ;;  %vm503_vm2 = vweird.f32 %v940_v39  ;;  %vm1305_vm4 = vmor %vm542_vm3, %vm543_vm1  ;;  %vm582_vm13 = vweird.f32 %v1284_v38 }
 0x1af   :  { %v538_v43 = vmul.f32 %v938_v9, %v537_v40  ;;  %vm1312_vm6 = vmor %vm502_vm5, %vm503_vm2 }
 0x1b0   :  { %v498_v45 = vmul.f32 %v940_v39, %v497_v42 }
 0x1b1   :  { %v443_v46 = vpop.xlane.xlu0 %442  ;;  %v539_v62 = vmul.f32 0.5, %v538_v43 }
 0x1b2   :  { %v435_v51 = vpop.xlane.xlu2 %434  ;;  %v469_v32 = vmul.f32 %v443_v46, %v1183_v22  ;;  %v499_v52 = vmul.f32 0.5, %v498_v45 }
 0x1b3   :  { %v465_v17 = vmul.f32 %v435_v51, %v1183_v22  ;;  %v540_v60 = vsub.f32 1.5, %v539_v62 }
 0x1b4   :  { %v1289_v54 = vpop.eup %941  ;;  %v1291_v55 = vadd.f32 1e-05, %v469_v32  ;;  %v500_v1 = vsub.f32 1.5, %v499_v52 }
 0x1b5   :  { %v577_v58 = vmul.f32 %v1289_v54, %v1284_v38  ;;  %v1295_v59 = vadd.f32 1e-05, %v465_v17  ;;  %v541_v3 = vmul.f32 %v938_v9, %v540_v60  ;;  %vm583_vm7 = vweird.f32 %v1289_v54  ;;  %v1350_v60 = vld [vmem:[%s1550_s4] ss:$0 sm:$0xff] }
 0x1b6   :  { %943 = vrsqrt.f32 %v1291_v55  ;;  %v501_v61 = vmul.f32 %v940_v39, %v500_v1  ;;  %vm552_vm11 = vweird.f32 %v1291_v55  ;;  %vm1366_vm15 = vmor %vm582_vm13, %vm583_vm7 }
 0x1b7   :  { %945 = vrsqrt.f32 %v1295_v59  ;;  %v578_v41 = vmul.f32 %v1289_v54, %v577_v58  ;;  %v545_v21 = vsel %vm1305_vm4, %v938_v9, %v541_v3  ;;  %vm512_vm8 = vweird.f32 %v1295_v59 }
 0x1b8   :  { %v505_v16 = vsel %vm1312_vm6, %v940_v39, %v501_v61  ;;  %v660_v34 = vmul.f32 %v545_v21, %v1188_v26 }
 0x1b9   :  { %v437_v25 = vpop.xlane.xlu0 %436  ;;  %v579_v18 = vmul.f32 0.5, %v578_v41  ;;  %v656_v40 = vmul.f32 %v505_v16, %v1191_v27 }
 0x1ba   :  { %v451_v4 = vpop.xlane.xlu1 %450  ;;  %v466_v5 = vmul.f32 %v437_v25, %v1183_v22  ;;  %v680_v27 = vmul.f32 %v1329_v33, %v660_v34 }
 0x1bb   :  { %v473_v6 = vmul.f32 %v451_v4, %v1183_v22  ;;  %v580_v31 = vsub.f32 1.5, %v579_v18  ;;  %v676_v1 = vmul.f32 %v1329_v33, %v656_v40 }
 0x1bc   :  { %v944_v0 = vpop.eup %943  ;;  %v1303_v14 = vadd.f32 1e-05, %v466_v5  ;;  %v700_v15 = vadd.f32 %v1350_v60, %v680_v27 }
 0x1bd   :  { %v946_v57 = vpop.eup %945  ;;  %v547_v20 = vmul.f32 %v944_v0, %v1291_v55  ;;  %v1317_v23 = vadd.f32 1e-05, %v473_v6  ;;  %vm553_vm9 = vweird.f32 %v944_v0  ;;  %v581_v52 = vmul.f32 %v1289_v54, %v580_v31 }
 0x1be   :  { %v507_v35 = vmul.f32 %v946_v57, %v1295_v59  ;;  %947 = vrsqrt.f32 %v1303_v14  ;;  %vm513_vm10 = vweird.f32 %v946_v57  ;;  %vm554_vm12 = vmor %vm552_vm11, %vm553_vm9  ;;  %v696_v18 = vadd.f32 %v1350_v60, %v676_v1 }
 0x1bf   :  { %v548_v53 = vmul.f32 %v944_v0, %v547_v20  ;;  %949 = vrsqrt.f32 %v1317_v23  ;;  %vm514_vm14 = vmor %vm512_vm8, %vm513_vm10  ;;  %v585_v38 = vsel %vm1366_vm15, %v1289_v54, %v581_v52  ;;  %vm592_vm0 = vweird.f32 %v1317_v23 }
 0x1c0   :  { %v508_v28 = vmul.f32 %v946_v57, %v507_v35  ;;  %v453_v29 = vpop.xlane.xlu2 %452  ;;  %vm522_vm10 = vweird.f32 %v1303_v14 }
 0x1c1   :  { %v549_v37 = vmul.f32 0.5, %v548_v53  ;;  %v474_v9 = vmul.f32 %v453_v29, %v1183_v22  ;;  %v455_v39 = vpop.xlane.xlu0 %454 }
 0x1c2   :  { %v509_v42 = vmul.f32 0.5, %v508_v28  ;;  %v445_v43 = vpop.xlane.xlu1 %444  ;;  %v475_v45 = vmul.f32 %v455_v39, %v1183_v22 }
 0x1c3   :  { %v550_v46 = vsub.f32 1.5, %v549_v37  ;;  %v1336_v62 = vadd.f32 1e-05, %v474_v9  ;;  %v470_v50 = vmul.f32 %v445_v43, %v1183_v22 }
 0x1c4   :  { %v510_v26 = vsub.f32 1.5, %v509_v42  ;;  %v1340_v51 = vadd.f32 1e-05, %v475_v45  ;;  %v1342_v32 = vpop.eup %947 }
 0x1c5   :  { %v551_v17 = vmul.f32 %v944_v0, %v550_v46  ;;  %951 = vrsqrt.f32 %v1336_v62  ;;  %v950_v58 = vpop.eup %949  ;;  %v517_v41 = vmul.f32 %v1342_v32, %v1303_v14  ;;  %v1356_v25 = vadd.f32 1e-05, %v470_v50 }
 0x1c6   :  { %v511_v55 = vmul.f32 %v946_v57, %v510_v26  ;;  %v587_v4 = vmul.f32 %v950_v58, %v1317_v23  ;;  %953 = vrsqrt.f32 %v1340_v51  ;;  %vm593_vm1 = vweird.f32 %v950_v58 }
 0x1c7   :  { %v555_v3 = vsel %vm554_vm12, %v944_v0, %v551_v17  ;;  %955 = vrsqrt.f32 %v1356_v25  ;;  %vm594_vm2 = vmor %vm592_vm0, %vm593_vm1  ;;  %vm602_vm3 = vweird.f32 %v1336_v62  ;;  %vm612_vm7 = vweird.f32 %v1340_v51 }
 0x1c8   :  { %v515_v61 = vsel %vm514_vm14, %v946_v57, %v511_v55  ;;  %v661_v6 = vmul.f32 %v555_v3, %v1212_v44  ;;  %957 = vrsqrt.f32 %v1322_v47  ;;  %v588_v0 = vmul.f32 %v950_v58, %v587_v4 }
 0x1c9   :  { %v657_v59 = vmul.f32 %v515_v61, %v1215_v48  ;;  %v461_v11 = vpop.xlane.xlu0 %460  ;;  %v518_v44 = vmul.f32 %v1342_v32, %v517_v41  ;;  %v664_v48 = vmul.f32 %v585_v38, %v1200_v10  ;;  %vm523_vm8 = vweird.f32 %v1342_v32 }
 0x1ca   :  { %v681_v57 = vmul.f32 %v1329_v33, %v661_v6  ;;  %v439_v20 = vpop.xlane.xlu1 %438  ;;  %v589_v35 = vmul.f32 0.5, %v588_v0  ;;  %v478_v54 = vmul.f32 %v461_v11, %v1183_v22  ;;  %vm1447_vm11 = vmor %vm522_vm10, %vm523_vm8  ;;  %vm562_vm15 = vweird.f32 %v1356_v25 }
 0x1cb   :  { %v952_v21 = vpop.eup %951  ;;  %v677_v36 = vmul.f32 %v1329_v33, %v657_v59  ;;  %v467_v16 = vmul.f32 %v439_v20, %v1183_v22  ;;  %v519_v40 = vmul.f32 0.5, %v518_v44  ;;  %v684_v1 = vmul.f32 %v1329_v33, %v664_v48 }
 0x1cc   :  { %v701_v53 = vadd.f32 %v1350_v60, %v681_v57  ;;  %v597_v28 = vmul.f32 %v952_v21, %v1336_v62  ;;  %v954_v29 = vpop.eup %953  ;;  %v590_v31 = vsub.f32 1.5, %v589_v35  ;;  %v1398_v26 = vadd.f32 1e-05, %v478_v54 }
 0x1cd   :  { %v697_v34 = vadd.f32 %v1350_v60, %v677_v36  ;;  %v1389_v37 = vadd.f32 1e-05, %v467_v16  ;;  %v1391_v9 = vpop.eup %955  ;;  %v607_v10 = vmul.f32 %v954_v29, %v1340_v51  ;;  %vm603_vm4 = vweird.f32 %v952_v21 }
 0x1ce   :  { %v841_v39 = vpack.c.bf16 %v701_v53, %v700_v15  ;;  %v598_v42 = vmul.f32 %v952_v21, %v597_v28  ;;  %v1394_v43 = vpop.eup %957  ;;  %v591_v46 = vmul.f32 %v950_v58, %v590_v31  ;;  %v557_v50 = vmul.f32 %v1391_v9, %v1356_v25  ;;  %vm604_vm6 = vmor %vm602_vm3, %vm603_vm4 }
 0x1cf   :  { %v831_v45 = vpack.c.bf16 %v697_v34, %v696_v18  ;;  %v608_v52 = vmul.f32 %v954_v29, %v607_v10  ;;  %959 = vrsqrt.f32 %v1389_v37  ;;  %v520_v5 = vsub.f32 1.5, %v519_v40 }
 0x1d0   :  { %869 = vst [vmem:[%s1551_s5 + $0x10] sm:$0xff] %v841_v39   ;;  %v599_v27 = vmul.f32 0.5, %v598_v42  ;;  %v447_v17 = vpop.xlane.xlu2 %446  ;;  %v595_v55 = vsel %vm594_vm2, %v950_v58, %v591_v46  ;;  %v558_v61 = vmul.f32 %v1391_v9, %v557_v50  ;;  %vm613_vm5 = vweird.f32 %v954_v29 }
 0x1d1   :  { %832 = vst [vmem:[%s1551_s5] sm:$0xff] %v831_v45   ;;  %v665_v41 = vmul.f32 %v595_v55, %v1227_v19  ;;  %v609_v23 = vmul.f32 0.5, %v608_v52  ;;  %961 = vrsqrt.f32 %v1398_v26  ;;  %v471_v59 = vmul.f32 %v447_v17, %v1183_v22  ;;  %vm614_vm9 = vmor %vm612_vm7, %vm613_vm5 }
 0x1d2   :  { %v600_v3 = vsub.f32 1.5, %v599_v27  ;;  %v463_v4 = vpop.xlane.xlu1 %462  ;;  %v617_v0 = vmul.f32 %v1394_v43, %v1322_v47  ;;  %v704_v19 = vadd.f32 %v1350_v60, %v684_v1  ;;  %v521_v36 = vmul.f32 %v1342_v32, %v520_v5 }
 0x1d3   :  { %v685_v6 = vmul.f32 %v1329_v33, %v665_v41  ;;  %v610_v58 = vsub.f32 1.5, %v609_v23  ;;  %v479_v11 = vmul.f32 %v463_v4, %v1183_v22  ;;  %v1424_v44 = vadd.f32 1e-05, %v471_v59 }
 0x1d4   :  { %v601_v38 = vmul.f32 %v952_v21, %v600_v3  ;;  %v559_v16 = vmul.f32 0.5, %v558_v61  ;;  %v618_v53 = vmul.f32 %v1394_v43, %v617_v0  ;;  %v525_v40 = vsel %vm1447_vm11, %v1342_v32, %v521_v36 }
 0x1d5   :  { %v705_v15 = vadd.f32 %v1350_v60, %v685_v6  ;;  %v611_v57 = vmul.f32 %v954_v29, %v610_v58  ;;  %v960_v20 = vpop.eup %959  ;;  %v1430_v62 = vadd.f32 1e-05, %v479_v11  ;;  %963 = vrsqrt.f32 %v1424_v44 }
 0x1d6   :  { %v605_v18 = vsel %vm604_vm6, %v952_v21, %v601_v38  ;;  %v527_v48 = vmul.f32 %v960_v20, %v1389_v37  ;;  %v560_v14 = vsub.f32 1.5, %v559_v16  ;;  %v619_v45 = vmul.f32 0.5, %v618_v53 }
 0x1d7   :  { %v666_v35 = vmul.f32 %v605_v18, %v1239_v49  ;;  %v851_v51 = vpack.c.bf16 %v705_v15, %v704_v19  ;;  %v615_v54 = vsel %vm614_vm9, %v954_v29, %v611_v57  ;;  %v1433_v21 = vpop.eup %961  ;;  %965 = vrsqrt.f32 %v1430_v62 }
 0x1d8   :  { %v667_v34 = vmul.f32 %v615_v54, %v1236_v12  ;;  %v528_v49 = vmul.f32 %v960_v20, %v527_v48  ;;  %v637_v29 = vmul.f32 %v1433_v21, %v1398_v26  ;;  %v459_v31 = vpop.xlane.xlu2 %458  ;;  %vm563_vm12 = vweird.f32 %v1391_v9 }
 0x1d9   :  { %v686_v28 = vmul.f32 %v1329_v33, %v666_v35  ;;  %871 = vst [vmem:[%s1551_s5 + $0x20] sm:$0xff] %v851_v51   ;;  %v477_v27 = vmul.f32 %v459_v31, %v1183_v22  ;;  %vm533_vm13 = vweird.f32 %v960_v20  ;;  %v658_v55 = vmul.f32 %v525_v40, %v1223_v56  ;;  %vm1479_vm2 = vmor %vm562_vm15, %vm563_vm12 }
 0x1da   :  { %v687_v12 = vmul.f32 %v1329_v33, %v667_v34  ;;  %v529_v42 = vmul.f32 0.5, %v528_v49  ;;  %v638_v10 = vmul.f32 %v1433_v21, %v637_v29  ;;  %vm532_vm14 = vweird.f32 %v1389_v37 }
 0x1db   :  { %v706_v46 = vadd.f32 %v1350_v60, %v686_v28  ;;  %v964_v1 = vpop.eup %963  ;;  %v1463_v41 = vadd.f32 1e-05, %v477_v27  ;;  %v561_v3 = vmul.f32 %v1391_v9, %v560_v14  ;;  %v620_v61 = vsub.f32 1.5, %v619_v45  ;;  %vm534_vm0 = vmor %vm532_vm14, %vm533_vm13 }
 0x1dc   :  { %v707_v50 = vadd.f32 %v1350_v60, %v687_v12  ;;  %v530_v52 = vsub.f32 1.5, %v529_v42  ;;  %v639_v17 = vmul.f32 0.5, %v638_v10  ;;  %v567_v5 = vmul.f32 %v964_v1, %v1424_v44 }
 0x1dd   :  { %v966_v22 = vpop.eup %965  ;;  %vm643_vm1 = vweird.f32 %v1433_v21  ;;  %967 = vrsqrt.f32 %v1463_v41  ;;  %v678_v58 = vmul.f32 %v1329_v33, %v658_v55  ;;  %v565_v0 = vsel %vm1479_vm2, %v1391_v9, %v561_v3 }
 0x1de   :  { %v856_v32 = vpack.c.bf16 %v707_v50, %v706_v46  ;;  %v531_v23 = vmul.f32 %v960_v20, %v530_v52  ;;  %v640_v4 = vsub.f32 1.5, %v639_v17  ;;  %v568_v6 = vmul.f32 %v964_v1, %v567_v5 }
 0x1df   :  { %v647_v38 = vmul.f32 %v966_v22, %v1430_v62  ;;  %vm642_vm3 = vweird.f32 %v1398_v26  ;;  %v621_v15 = vmul.f32 %v1394_v43, %v620_v61  ;;  %vm623_vm4 = vweird.f32 %v1394_v43 }
 0x1e0   :  { %872 = vst [vmem:[%s1551_s5 + $0x28] sm:$0xff] %v856_v32   ;;  %v535_v56 = vsel %vm534_vm0, %v960_v20, %v531_v23  ;;  %v641_v37 = vmul.f32 %v1433_v21, %v640_v4  ;;  %v569_v19 = vmul.f32 0.5, %v568_v6  ;;  %vm1493_vm5 = vmor %vm642_vm3, %vm643_vm1  ;;  %vm573_vm6 = vweird.f32 %v964_v1 }
 0x1e1   :  { %v659_v59 = vmul.f32 %v535_v56, %v1257_v30  ;;  %v648_v11 = vmul.f32 %v966_v22, %v647_v38  ;;  %v698_v36 = vadd.f32 %v1350_v60, %v678_v58  ;;  %v662_v35 = vmul.f32 %v565_v0, %v1243_v63 }
 0x1e2   :  { %v645_v30 = vsel %vm1493_vm5, %v1433_v21, %v641_v37  ;;  %v570_v9 = vsub.f32 1.5, %v569_v19  ;;  %vm572_vm7 = vweird.f32 %v1424_v44  ;;  %vm653_vm8 = vweird.f32 %v966_v22 }
 0x1e3   :  { %v679_v18 = vmul.f32 %v1329_v33, %v659_v59  ;;  %v649_v26 = vmul.f32 0.5, %v648_v11  ;;  %v968_v20 = vpop.eup %967  ;;  %vm622_vm9 = vweird.f32 %v1322_v47  ;;  %v670_v53 = vmul.f32 %v645_v30, %v1254_v2  ;;  %vm574_vm10 = vmor %vm572_vm7, %vm573_vm6 }
 0x1e4   :  { %v571_v16 = vmul.f32 %v964_v1, %v570_v9  ;;  %v627_v48 = vmul.f32 %v968_v20, %v1463_v41  ;;  %vm1509_vm11 = vmor %vm622_vm9, %vm623_vm4  ;;  %vm652_vm12 = vweird.f32 %v1430_v62  ;;  %v682_v49 = vmul.f32 %v1329_v33, %v662_v35 }
 0x1e5   :  { %v699_v51 = vadd.f32 %v1350_v60, %v679_v18  ;;  %v650_v54 = vsub.f32 1.5, %v649_v26  ;;  %vm654_vm13 = vmor %vm652_vm12, %vm653_vm8  ;;  %v625_v47 = vsel %vm1509_vm11, %v1394_v43, %v621_v15  ;;  %v690_v39 = vmul.f32 %v1329_v33, %v670_v53 }
 0x1e6   :  { %v575_v63 = vsel %vm574_vm10, %v964_v1, %v571_v16  ;;  %v628_v44 = vmul.f32 %v968_v20, %v627_v48  ;;  %vm633_vm14 = vweird.f32 %v968_v20  ;;  %v668_v14 = vmul.f32 %v625_v47, %v1203_v13 }
 0x1e7   :  { %v836_v21 = vpack.c.bf16 %v699_v51, %v698_v36  ;;  %v651_v34 = vmul.f32 %v966_v22, %v650_v54  ;;  %v663_v2 = vmul.f32 %v575_v63, %v1269_v8  ;;  %v702_v42 = vadd.f32 %v1350_v60, %v682_v49 }
 0x1e8   :  { %v629_v31 = vmul.f32 0.5, %v628_v44  ;;  %vm632_vm15 = vweird.f32 %v1463_v41  ;;  %v710_v43 = vadd.f32 %v1350_v60, %v690_v39  ;;  %v688_v27 = vmul.f32 %v1329_v33, %v668_v14 }
 0x1e9   :  { %868 = vst [vmem:[%s1551_s5 + $0x8] sm:$0xff] %v836_v21   ;;  %v655_v29 = vsel %vm654_vm13, %v966_v22, %v651_v34  ;;  %v683_v62 = vmul.f32 %v1329_v33, %v663_v2  ;;  %vm634_vm0 = vmor %vm632_vm15, %vm633_vm14 }
 0x1ea   :  { %v671_v12 = vmul.f32 %v655_v29, %v1266_v7  ;;  %v630_v40 = vsub.f32 1.5, %v629_v31  ;;  %v708_v1 = vadd.f32 %v1350_v60, %v688_v27 }
 0x1eb   :  { %v703_v8 = vadd.f32 %v1350_v60, %v683_v62 }
 0x1ec   :  { %v691_v10 = vmul.f32 %v1329_v33, %v671_v12  ;;  %v631_v45 = vmul.f32 %v968_v20, %v630_v40 }
 0x1ed   :  { %v846_v46 = vpack.c.bf16 %v703_v8, %v702_v42 }
 0x1ee   :  { %v711_v50 = vadd.f32 %v1350_v60, %v691_v10  ;;  %v635_v7 = vsel %vm634_vm0, %v968_v20, %v631_v45 }
 0x1ef   :  { %870 = vst [vmem:[%s1551_s5 + $0x18] sm:$0xff] %v846_v46   ;;  %v669_v52 = vmul.f32 %v635_v7, %v1277_v24 }
 0x1f0   :  { %v866_v13 = vpack.c.bf16 %v711_v50, %v710_v43 }
 0x1f1   :  { %v689_v17 = vmul.f32 %v1329_v33, %v669_v52 }
 0x1f2   :  { %874 = vst [vmem:[%s1551_s5 + $0x38] sm:$0xff] %v866_v13  }
 0x1f3   :  { %v709_v55 = vadd.f32 %v1350_v60, %v689_v17 }
 0x1f5   :  { %v861_v32 = vpack.c.bf16 %v709_v55, %v708_v1 }
 0x1f7   :  { %873 = vst [vmem:[%s1551_s5 + $0x30] sm:$0xff] %v861_v32  }

</bundles_post_ra>
